<compile_context>
chip_gen: v6e
topology: v6e:2x2x1
jax: 0.10.0
libtpu: 0.0.40
codegen_flags: <defaults>
</compile_context>

<pallas_src>
import jax
import jax.numpy as jnp
from jax.experimental import pallas as pl
from jax.experimental.pallas import tpu as pltpu

_LANE = 128


def _static_bn_kernel(x_ref, scale_ref, bias_ref, o_ref):
    # x_ref / o_ref: (row_tile, col_tile).  scale_ref / bias_ref: f32 blocks of
    # shape (row_tile, 1) or (1, col_tile); jnp broadcasting covers both.
    x = x_ref[...].astype(jnp.float32)
    o_ref[...] = (x * scale_ref[...] + bias_ref[...]).astype(o_ref.dtype)


def _tpu_params():
    """(vmem_capacity_bytes, num_tensorcores) with safe fallbacks."""
    vmem_cap = 128 * 1024 * 1024
    try:
        info = pltpu.get_tpu_info()
        vmem_cap = int(getattr(info, "vmem_capacity_bytes", vmem_cap))
    except Exception:
        pass
    # v7x exposes 64 MiB VMEM per TensorCore and has 2 TCs; v5e/v6e are 128 MiB / 1 TC.
    num_tc = 2 if vmem_cap <= 96 * 1024 * 1024 else 1
    return vmem_cap, num_tc


def _fit_tiles(rows, cols, itemsize, sublane, target_bytes):
    """Pick (row_tile, col_tile) targeting ~target_bytes per data block."""
    min_rows = min(rows, sublane)
    if cols <= _LANE or cols * min_rows * itemsize <= target_bytes:
        col_tile = cols
    else:
        col_tile = max(_LANE,
                       (target_bytes // (min_rows * itemsize)) // _LANE * _LANE)
        col_tile = min(col_tile, pl.cdiv(cols, _LANE) * _LANE)

    if rows <= sublane:
        row_tile = rows                     # full-dim block (allowed)
    else:
        rt = (target_bytes // max(1, col_tile * itemsize)) // sublane * sublane
        row_tile = max(sublane, min(rt, pl.cdiv(rows, sublane) * sublane))
    return row_tile, col_tile


def _adjust_for_cores(rows, cols, row_tile, col_tile, sublane, num_tc):
    """On 2-TC chips prefer an even, >=2 step grid (keep blocks as big as possible)."""
    if num_tc < 2:
        return row_tile, col_tile

    row_cands = [row_tile]
    if rows > sublane:
        rt = row_tile
        for _ in range(3):
            nrt = max(sublane, (rt // 2) // sublane * sublane)
            if nrt == rt:
                break
            row_cands.append(nrt)
            rt = nrt
    col_cands = [col_tile]
    if cols > _LANE:
        ct = col_tile
        for _ in range(3):
            nct = max(_LANE, (ct // 2) // _LANE * _LANE)
            if nct == ct:
                break
            col_cands.append(nct)
            ct = nct

    best_rt, best_ct, best_key = row_tile, col_tile, None
    for rt in row_cands:
        for ct in col_cands:
            g = pl.cdiv(rows, rt) * pl.cdiv(cols, ct)
            cat = 0 if (g >= 2 and g % 2 == 0) else (1 if g >= 2 else 2)
            eff_block = min(rt, rows) * min(ct, cols)
            key = (cat, -eff_block, g)
            if best_key is None or key < best_key:
                best_key, best_rt, best_ct = key, rt, ct
    return best_rt, best_ct


def _padded_block_bytes(r, c, itemsize, sublane):
    return (pl.cdiv(r, sublane) * sublane) * (pl.cdiv(c, _LANE) * _LANE) * itemsize


def static_batch_norm_2d(x, weight, bias, running_mean, running_var, eps=1e-5,
                         *, target_block_bytes=None, vmem_limit_bytes=None,
                         donate_x=False):
    """Forward of StaticBatchNorm2d. x: (N, C, H, W). Returns same shape/dtype."""
    N, C, H, W = x.shape
    hw = H * W
    itemsize = jnp.dtype(x.dtype).itemsize
    sublane = max(8, 32 // itemsize)        # f32: 8, bf16: 16, int8/fp8: 32

    vmem_cap, num_tc = _tpu_params()
    if target_block_bytes is None:
        # ~8 MiB blocks on v7x (64 MiB VMEM / 3.2 TB/s), ~12 MiB on v5e/v6e.
        target_block_bytes = (8 * 1024 * 1024 if vmem_cap <= 96 * 1024 * 1024
                              else 12 * 1024 * 1024)

    # ---- per-channel affine params (cheap O(C) glue), kept in f32 ----
    scale_c = (weight.astype(jnp.float32)
               * jax.lax.rsqrt(running_var.astype(jnp.float32) + jnp.float32(eps)))
    bias_c = bias.astype(jnp.float32) - running_mean.astype(jnp.float32) * scale_c

    # ---- choose a lane-dense flattening ----
    if hw % _LANE == 0:
        # rows = batch*channel (one scale per row), lanes = spatial (dense).
        rows, cols = N * C, hw
        x2 = x.reshape(rows, cols)
        scale2 = jnp.tile(scale_c, N).reshape(rows, 1)
        bias2 = jnp.tile(bias_c, N).reshape(rows, 1)
        per_row_params = True
    else:
        # 7x7 / 14x14 style maps: keep stores lane-dense by flattening the
        # channel+spatial axes into the lane axis and expanding the params
        # per lane.  Param HBM traffic is cols*8 bytes total (DMA'd once per
        # column block because the column axis is the outer grid axis).
        # TODO(synk): for N < 8 this still wastes sublanes / adds relative
        # param traffic; folding channel groups into rows would fix it.
        rows, cols = N, C * hw
        x2 = x.reshape(rows, cols)
        scale2 = jnp.repeat(scale_c, hw).reshape(1, cols)
        bias2 = jnp.repeat(bias_c, hw).reshape(1, cols)
        per_row_params = False

    # ---- tiling ----
    row_tile, col_tile = _fit_tiles(rows, cols, itemsize, sublane,
                                    target_block_bytes)
    row_tile, col_tile = _adjust_for_cores(rows, cols, row_tile, col_tile,
                                           sublane, num_tc)
    rows_grid = pl.cdiv(rows, row_tile)
    cols_grid = pl.cdiv(cols, col_tile)

    if per_row_params:
        # Row axis outermost: the (row_tile, 1) param blocks are re-DMA'd only
        # when the row-block index changes (rows_grid times total).
        grid = (rows_grid, cols_grid)
        data_spec = pl.BlockSpec((row_tile, col_tile), lambda ri, ci: (ri, ci))
        param_spec = pl.BlockSpec((row_tile, 1), lambda ri, ci: (ri, 0))
    else:
        # Column axis outermost: the (1, col_tile) param blocks are re-DMA'd
        # only when the column-block index changes (cols_grid times total).
        grid = (cols_grid, rows_grid)
        data_spec = pl.BlockSpec((row_tile, col_tile), lambda ci, ri: (ri, ci))
        param_spec = pl.BlockSpec((1, col_tile), lambda ci, ri: (0, ci))

    # ---- VMEM limit sized from the actual double-buffered footprint ----
    x_blk = _padded_block_bytes(row_tile, col_tile, itemsize, sublane)
    if per_row_params:
        p_blk = _padded_block_bytes(row_tile, 1, 4, 8)
    else:
        p_blk = _padded_block_bytes(1, col_tile, 4, 8)
    footprint = 2 * (2 * x_blk) + 2 * (2 * p_blk)   # in+out and scale+bias, double-buffered
    if vmem_limit_bytes is None:
        vmem_limit_bytes = min(max(footprint + 8 * 1024 * 1024, 32 * 1024 * 1024),
                               int(vmem_cap * 3 // 4))

    cost = pl.CostEstimate(
        flops=2 * rows * cols,
        transcendentals=0,
        bytes_accessed=2 * rows * cols * itemsize
        + int(scale2.size + bias2.size) * 4,
    )

    out2 = pl.pallas_call(
        _static_bn_kernel,
        out_shape=jax.ShapeDtypeStruct((rows, cols), x.dtype),
        grid_spec=pltpu.PrefetchScalarGridSpec(
            num_scalar_prefetch=0,
            grid=grid,
            in_specs=[data_spec, param_spec, param_spec],
            out_specs=data_spec,
        ),
        compiler_params=pltpu.CompilerParams(
            dimension_semantics=("parallel", "parallel"),
            vmem_limit_bytes=int(vmem_limit_bytes),
        ),
        cost_estimate=cost,
        input_output_aliases=({0: 0} if donate_x else {}),
    )(x2, scale2, bias2)

    return out2.reshape(N, C, H, W)


if __name__ == "__main__":
    key = jax.random.PRNGKey(0)
    eps = 1e-5

    def run_case(case_key, N, C, H, W):
        kx, kw, kb, km, kv = jax.random.split(case_key, 5)
        x = jax.random.normal(kx, (N, C, H, W), dtype=jnp.float32)
        # Parameters matching StaticBatchNorm2d.__init__ shapes, perturbed so
        # the affine transform is actually exercised.
        weight = jnp.ones((C,), jnp.float32) + 0.1 * jax.random.normal(kw, (C,))
        bias = jnp.zeros((C,), jnp.float32) + 0.1 * jax.random.normal(kb, (C,))
        running_mean = 0.1 * jax.random.normal(km, (C,))
        running_var = jnp.ones((C,), jnp.float32) - eps + 0.05 * jnp.abs(
            jax.random.normal(kv, (C,)))

        out = jax.block_until_ready(
            static_batch_norm_2d(x, weight, bias, running_mean, running_var, eps))

        # Reference (pure JAX, mirrors the PyTorch forward).
        scale_r = (weight * jax.lax.rsqrt(running_var + eps)).reshape(1, C, 1, 1)
        bias_r = bias.reshape(1, C, 1, 1) - running_mean.reshape(1, C, 1, 1) * scale_r
        ref = x * scale_r + bias_r

        assert out.shape == x.shape and out.dtype == x.dtype
        assert jnp.allclose(out, ref, atol=1e-5, rtol=1e-5), "mismatch vs reference"

    k1, k2 = jax.random.split(key)
    run_case(k1, 2, 4, 16, 16)   # H*W % 128 == 0 -> per-row-param (N*C, H*W) path
    run_case(k2, 2, 4, 7, 7)     # H*W % 128 != 0 -> lane-dense per-lane-param path
    print("KERNEL_OK")
</pallas_src>

<mosaic_0001>
module attributes {stable_mosaic.version = 11 : i64} {
  func.func @_static_bn_kernel(%arg0: i32, %arg1: i32, %arg2: memref<8x256xf32, #tpu.memory_space<vmem>>, %arg3: memref<8x1xf32, #tpu.memory_space<vmem>>, %arg4: memref<8x1xf32, #tpu.memory_space<vmem>>, %arg5: memref<8x256xf32, #tpu.memory_space<vmem>>) attributes {dimension_semantics = [#tpu.dimension_semantics<parallel>, #tpu.dimension_semantics<parallel>], iteration_bounds = array<i64: 1, 1>, scalar_prefetch = 0 : i64, scratch_operands = 0 : i64, tpu.core_type = #tpu.core_type<tc>, window_params = [{transform_indices = @transform_0, window_bounds = array<i64: 8, 256>}, {transform_indices = @transform_1, window_bounds = array<i64: 8, 1>}, {transform_indices = @transform_2, window_bounds = array<i64: 8, 1>}, {transform_indices = @transform_3, window_bounds = array<i64: 8, 256>}]} {
    %c0 = arith.constant 0 : index
    %c0_0 = arith.constant 0 : index
    %0 = vector.load %arg2[%c0, %c0_0] : memref<8x256xf32, #tpu.memory_space<vmem>>, vector<8x256xf32>
    %c0_1 = arith.constant 0 : index
    %c0_2 = arith.constant 0 : index
    %1 = vector.load %arg3[%c0_1, %c0_2] : memref<8x1xf32, #tpu.memory_space<vmem>>, vector<8x1xf32>
    %2 = vector.broadcast %1 : vector<8x1xf32> to vector<8x256xf32>
    %3 = arith.mulf %0, %2 : vector<8x256xf32>
    %c0_3 = arith.constant 0 : index
    %c0_4 = arith.constant 0 : index
    %4 = vector.load %arg4[%c0_3, %c0_4] : memref<8x1xf32, #tpu.memory_space<vmem>>, vector<8x1xf32>
    %5 = vector.broadcast %4 : vector<8x1xf32> to vector<8x256xf32>
    %6 = arith.addf %3, %5 : vector<8x256xf32>
    %c0_5 = arith.constant 0 : index
    %c0_6 = arith.constant 0 : index
    %7 = vector.load %arg5[%c0_5, %c0_6] : memref<8x256xf32, #tpu.memory_space<vmem>>, vector<8x256xf32>
    tpu.vector_store %arg5[%c0_5, %c0_6], %6 {strides = array<i32>} : memref<8x256xf32, #tpu.memory_space<vmem>>, vector<8x256xf32>,
    return
  }
  func.func @transform_0(%arg0: i32, %arg1: i32) -> (i32, i32) {
    %c0_i32 = arith.constant 0 : i32
    return %arg0, %arg1 : i32, i32
  }
  func.func @transform_1(%arg0: i32, %arg1: i32) -> (i32, i32) {
    %c0_i32 = arith.constant 0 : i32
    %c0_i32_0 = arith.constant 0 : i32
    return %arg0, %c0_i32 : i32, i32
  }
  func.func @transform_2(%arg0: i32, %arg1: i32) -> (i32, i32) {
    %c0_i32 = arith.constant 0 : i32
    %c0_i32_0 = arith.constant 0 : i32
    return %arg0, %c0_i32 : i32, i32
  }
  func.func @transform_3(%arg0: i32, %arg1: i32) -> (i32, i32) {
    %c0_i32 = arith.constant 0 : i32
    return %arg0, %arg1 : i32, i32
  }
}

</mosaic_0001>

<bundles_post_ra>
// kernel: tpu_custom_call.1
= control target key start
LH: loop header
LB: loop body
LE: loop exit
PB: predicated region body
PF: predicated region fallthrough
CT: control target
= control target key end

     0   :  { %v74_v1 = vmov 0   ;;  %s111_s0 = inlined_call_operand.vmem [shape: f32[8,256], index: 0, kind: input, shape index: {}]   ;;  %s112_s1 = inlined_call_operand.vmem [shape: f32[8,1], index: 1, kind: input, shape index: {}]   ;;  %s113_s2 = inlined_call_operand.vmem [shape: f32[8,1], index: 2, kind: input, shape index: {}]   ;;  %s114_s3 = inlined_call_operand.hbm [shape: f32[8,256], index: 3, kind: output, shape index: {}]  }
   0x1   :  { %v17_v0 = vld [vmem:[%s112_s1] sm:$0xff]  ;;  %51 = vset.pattern.permute.xlu0 %v74_v1 }
   0x2   :  { %8 = vsyncpa [#allocation3], 0  ;;  %20 = vperm.xlu0 %51, %v17_v0   ;;  %v25_v2 = vld [vmem:[%s113_s2] sm:$0xff]  ;;  %v16_v5 = vld [vmem:[%s111_s0 + $0x8] sm:$0xff]  ;;  %s75_s20 = smov [#allocation2]  }
   0x3   :  { %v15_v4 = vld [vmem:[%s111_s0] sm:$0xff]  ;;  %s41_s1 = sshll.u32 %s75_s20, 4  ;;  %s42_s1 = int_to_ptr.vmem [resolvable:$true] %s41_s1 }
   0x4   :  { %s52_s2 = scalar_lea.vmem %s42_s1, 256  ;;  %p57_p1 = scmp.lt.s32.totalorder %s42_s1, %s42_s1 }
   0x5   :  { %p53_p0 = scmp.ne.s32.totalorder %s42_s1, %s52_s2  ;;  %p58_p2 = scmp.lt.s32.totalorder %s52_s2, %s52_s2 }
   0x6   :  { %28 = vperm.xlu0 %51, %v25_v2  }
   0x7   :  { %p59_p3 = por %p58_p2, %p57_p1 }
   0x9   :  { %p60_p4 = pnand %p59_p3, %p53_p0 }
  0x7d   :  { %v21_v3 = vpop.permute.xlu0 %20 }
  0x7e   :  { %v23_v6 = vmul.f32 %v21_v3, %v15_v4  ;;  %v24_v7 = vmul.f32 %v21_v3, %v16_v5 }
  0x81   :  { %v29_v8 = vpop.permute.xlu0 %28 }
  0x82   :  { %v31_v9 = vadd.f32 %v29_v8, %v23_v6  ;;  %v32_v10 = vadd.f32 %v29_v8, %v24_v7 }
  0x84   :  { %33 = vst [vmem:[#allocation2] sm:$0xff] %v31_v9  ;;  %34 = vst [vmem:[#allocation2 + $0x8] sm:$0xff] %v32_v10 }
  0x85   :  { %63 = shalt.err (!%p60_p4)
}
  0x86   :  { %44 = dma.vmem_to_hbm [thread:$0]  %s42_s1, 256, %s114_s3, [#allocation3]  }
  0x87   :  { %72 = dma.done.wait [#allocation3], 256  }
  0x88   :  { %73 = vsyncadd [#allocation3], 4294967040 }
  0x89   :  { %48 = vsyncpa [#allocation3], 1 }

</bundles_post_ra>
